<compile_context>
chip_gen: v7x
topology: tpu7x:2x2x1
jax: 0.10.0
libtpu: 0.0.40
codegen_flags: <defaults>
</compile_context>

<pallas_src>
import functools

import jax
import jax.numpy as jnp
from jax.experimental import pallas as pl
from jax.experimental.pallas import tpu as pltpu


def _triplet_kernel(a_ref, p_ref, n_ref, o_ref, *, margin, total_b, tb):
    """One batch tile -> one per-block partial sum.

    a_ref/p_ref/n_ref : (tb, D) VMEM tiles
    o_ref             : (1, 1) f32 partial sum for this grid step (unique block)
    """
    i = pl.program_id(0)

    a = a_ref[...].astype(jnp.float32)
    p = p_ref[...].astype(jnp.float32)
    n = n_ref[...].astype(jnp.float32)

    # Fused: single cross-lane reduction of ((a-p)^2 - (a-n)^2).
    diff = (a - p) * (a - p) - (a - n) * (a - n)          # (tb, D)
    row = jnp.sum(diff, axis=1, keepdims=True)            # (tb, 1)
    losses = jnp.maximum(row + margin, 0.0)               # relu

    # Mask rows that only exist because the batch was padded up to tb.
    row_ids = jax.lax.broadcasted_iota(jnp.int32, losses.shape, 0) + i * tb
    losses = jnp.where(row_ids < total_b, losses, 0.0)

    o_ref[...] = jnp.sum(losses, axis=0, keepdims=True)   # (1, 1)


def _pick_tb(B, D, itemsize, vmem_budget_bytes=24 << 20, tb_cap=2048):
    """Largest batch tile such that 3 inputs x 2 pipeline buffers fit the budget."""
    per_row = 3 * 2 * D * itemsize
    tb = min(tb_cap, max(8, vmem_budget_bytes // per_row))
    tb = max(8, (tb // 8) * 8)                  # multiple of 8 sublanes
    b_pad8 = pl.cdiv(B, 8) * 8
    tb = min(tb, b_pad8)                        # never bigger than padded batch
    return tb
    # TODO(synk): for very large D (>= ~4K) split D onto a second "arbitrary"
    # grid axis with per-row partial accumulators instead of shrinking tb.


def triplet_loss(anchor, positive, negative, margin=1.0, tb=None):
    """Pallas implementation of TripletLoss.forward. Returns a scalar f32."""
    B, D = anchor.shape
    if tb is None:
        tb = _pick_tb(B, D, jnp.dtype(anchor.dtype).itemsize)

    num_blocks = pl.cdiv(B, tb)
    b_pad = num_blocks * tb
    if b_pad != B:
        pad = ((0, b_pad - B), (0, 0))
        anchor = jnp.pad(anchor, pad)
        positive = jnp.pad(positive, pad)
        negative = jnp.pad(negative, pad)

    kernel = functools.partial(
        _triplet_kernel, margin=float(margin), total_b=B, tb=tb)

    partials = pl.pallas_call(
        kernel,
        out_shape=jax.ShapeDtypeStruct((num_blocks, 1), jnp.float32),
        grid_spec=pltpu.PrefetchScalarGridSpec(
            num_scalar_prefetch=0,
            grid=(num_blocks,),
            in_specs=[
                pl.BlockSpec((tb, D), lambda i: (i, 0)),
                pl.BlockSpec((tb, D), lambda i: (i, 0)),
                pl.BlockSpec((tb, D), lambda i: (i, 0)),
            ],
            out_specs=pl.BlockSpec((1, 1), lambda i: (i, 0)),
        ),
        compiler_params=pltpu.CompilerParams(
            dimension_semantics=("parallel",),   # independent per-block partials
            vmem_limit_bytes=32 << 20,           # safe on v5e/v6e/v7x
        ),
    )(anchor, positive, negative)

    # mean over the true (unpadded) batch, done in the wrapper.
    return jnp.sum(partials) / B


def _ref_loss(anchor, positive, negative, margin=1.0):
    dp = jnp.sum((anchor - positive) ** 2, axis=1)
    dn = jnp.sum((anchor - negative) ** 2, axis=1)
    return jnp.mean(jnp.maximum(dp - dn + margin, 0.0))


if __name__ == "__main__":
    key = jax.random.PRNGKey(0)

    # case 1: batch divisible by the tile
    B, D = 16, 128
    k1, k2, k3, k4, k5, k6 = jax.random.split(key, 6)
    anchor = jax.random.normal(k1, (B, D), dtype=jnp.float32)
    positive = jax.random.normal(k2, (B, D), dtype=jnp.float32)
    negative = jax.random.normal(k3, (B, D), dtype=jnp.float32)

    loss = triplet_loss(anchor, positive, negative, margin=1.0)
    jax.block_until_ready(loss)
    ref = _ref_loss(anchor, positive, negative, margin=1.0)
    assert jnp.allclose(loss, ref, atol=1e-5, rtol=1e-5), (loss, ref)

    # case 2: ragged batch (exercises padding + in-kernel masking)
    B2 = 10
    a2 = jax.random.normal(k4, (B2, D), dtype=jnp.float32)
    p2 = jax.random.normal(k5, (B2, D), dtype=jnp.float32)
    n2 = jax.random.normal(k6, (B2, D), dtype=jnp.float32)

    loss2 = triplet_loss(a2, p2, n2, margin=1.0)
    jax.block_until_ready(loss2)
    ref2 = _ref_loss(a2, p2, n2, margin=1.0)
    assert jnp.allclose(loss2, ref2, atol=1e-5, rtol=1e-5), (loss2, ref2)

    print("KERNEL_OK")
</pallas_src>

<mosaic_0001>
module attributes {stable_mosaic.version = 11 : i64} {
  func.func @_triplet_kernel(%arg0: i32, %arg1: memref<16x128xf32, #tpu.memory_space<vmem>>, %arg2: memref<16x128xf32, #tpu.memory_space<vmem>>, %arg3: memref<16x128xf32, #tpu.memory_space<vmem>>, %arg4: memref<1x1xf32, #tpu.memory_space<vmem>>) attributes {dimension_semantics = [#tpu.dimension_semantics<parallel>], iteration_bounds = array<i64: 1>, scalar_prefetch = 0 : i64, scratch_operands = 0 : i64, tpu.core_type = #tpu.core_type<tc>, window_params = [{transform_indices = @transform_0, window_bounds = array<i64: 16, 128>}, {transform_indices = @transform_1, window_bounds = array<i64: 16, 128>}, {transform_indices = @transform_2, window_bounds = array<i64: 16, 128>}, {transform_indices = @transform_3, window_bounds = array<i64: 1, 1>}]} {
    %c0 = arith.constant 0 : index
    %c0_0 = arith.constant 0 : index
    %0 = vector.load %arg1[%c0, %c0_0] : memref<16x128xf32, #tpu.memory_space<vmem>>, vector<16x128xf32>
    %c0_1 = arith.constant 0 : index
    %c0_2 = arith.constant 0 : index
    %1 = vector.load %arg2[%c0_1, %c0_2] : memref<16x128xf32, #tpu.memory_space<vmem>>, vector<16x128xf32>
    %c0_3 = arith.constant 0 : index
    %c0_4 = arith.constant 0 : index
    %2 = vector.load %arg3[%c0_3, %c0_4] : memref<16x128xf32, #tpu.memory_space<vmem>>, vector<16x128xf32>
    %3 = arith.subf %0, %1 : vector<16x128xf32>
    %4 = arith.subf %0, %1 : vector<16x128xf32>
    %5 = arith.mulf %3, %4 : vector<16x128xf32>
    %6 = arith.subf %0, %2 : vector<16x128xf32>
    %7 = arith.subf %0, %2 : vector<16x128xf32>
    %8 = arith.mulf %6, %7 : vector<16x128xf32>
    %9 = arith.subf %5, %8 : vector<16x128xf32>
    %cst = arith.constant dense<0.000000e+00> : vector<16xf32>
    %10 = vector.multi_reduction <add>, %9, %cst [1] : vector<16x128xf32> to vector<16xf32>
    %11 = vector.shape_cast %10 : vector<16xf32> to vector<16x1xf32>
    %cst_5 = arith.constant 1.000000e+00 : f32
    %12 = vector.broadcast %cst_5 : f32 to vector<16x1xf32>
    %13 = arith.addf %11, %12 : vector<16x1xf32>
    %cst_6 = arith.constant 0.000000e+00 : f32
    %14 = vector.broadcast %cst_6 : f32 to vector<16x1xf32>
    %15 = arith.maximumf %13, %14 : vector<16x1xf32>
    %16 = tpu.iota {dimensions = array<i32: 0>} : vector<16x1xi32>
    %c16_i32 = arith.constant 16 : i32
    %17 = arith.muli %arg0, %c16_i32 : i32
    %18 = vector.broadcast %17 : i32 to vector<16x1xi32>
    %19 = arith.addi %16, %18 : vector<16x1xi32>
    %c16_i32_7 = arith.constant 16 : i32
    %20 = vector.broadcast %c16_i32_7 : i32 to vector<16x1xi32>
    %21 = arith.cmpi slt, %19, %20 : vector<16x1xi32>
    %cst_8 = arith.constant 0.000000e+00 : f32
    %22 = vector.broadcast %cst_8 : f32 to vector<16x1xf32>
    %23 = arith.select %21, %15, %22 : vector<16x1xi1>, vector<16x1xf32>
    %cst_9 = arith.constant dense<0.000000e+00> : vector<1xf32>
    %24 = vector.multi_reduction <add>, %23, %cst_9 [0] : vector<16x1xf32> to vector<1xf32>
    %25 = vector.shape_cast %24 : vector<1xf32> to vector<1x1xf32>
    %c0_10 = arith.constant 0 : index
    %c0_11 = arith.constant 0 : index
    %26 = vector.load %arg4[%c0_10, %c0_11] : memref<1x1xf32, #tpu.memory_space<vmem>>, vector<1x1xf32>
    tpu.vector_store %arg4[%c0_10, %c0_11], %25 {strides = array<i32>} : memref<1x1xf32, #tpu.memory_space<vmem>>, vector<1x1xf32>,
    return
  }
  func.func @transform_0(%arg0: i32) -> (i32, i32) {
    %c0_i32 = arith.constant 0 : i32
    %c0_i32_0 = arith.constant 0 : i32
    return %arg0, %c0_i32 : i32, i32
  }
  func.func @transform_1(%arg0: i32) -> (i32, i32) {
    %c0_i32 = arith.constant 0 : i32
    %c0_i32_0 = arith.constant 0 : i32
    return %arg0, %c0_i32 : i32, i32
  }
  func.func @transform_2(%arg0: i32) -> (i32, i32) {
    %c0_i32 = arith.constant 0 : i32
    %c0_i32_0 = arith.constant 0 : i32
    return %arg0, %c0_i32 : i32, i32
  }
  func.func @transform_3(%arg0: i32) -> (i32, i32) {
    %c0_i32 = arith.constant 0 : i32
    %c0_i32_0 = arith.constant 0 : i32
    return %arg0, %c0_i32 : i32, i32
  }
}

</mosaic_0001>

<bundles_post_ra>
// kernel: tpu_custom_call.1
= control target key start
LH: loop header
LB: loop body
LE: loop exit
PB: predicated region body
PF: predicated region fallthrough
CT: control target
= control target key end

     0   :  { %8 = vsyncpa [#allocation3], 0  ;;  %s306_s0 = inlined_call_operand.hbm [shape: f32[16,128], index: 0, kind: input, shape index: {}]   ;;  %s307_s1 = inlined_call_operand.hbm [shape: f32[16,128], index: 1, kind: input, shape index: {}]   ;;  %s308_s2 = inlined_call_operand.hbm [shape: f32[16,128], index: 2, kind: input, shape index: {}]   ;;  %s309_s3 = inlined_call_operand.hbm [shape: f32[1,1], index: 3, kind: output, shape index: {}]  }
   0x1   :  { %9 = vsyncpa [#allocation6], 0 }
   0x2   :  { %10 = vsyncpa [#allocation4], 0  ;;  %s216_s12 = smov [#allocation5]   ;;  %s217_s14 = smov [#allocation2]  }
   0x3   :  { %s28_s13 = sshll.u32 %s216_s12, 4  ;;  %s16_s15 = sshll.u32 %s217_s14, 4  ;;  %s29_s13 = int_to_ptr.vmem [resolvable:$true] %s28_s13  ;;  %s242_s15 = int_to_ptr.vmem [resolvable:$true] %s16_s15 }
   0x4   :  { %s122_s18 = scalar_lea.hbm %s307_s1, 256 }
   0x5   :  { %p123_p0 = scmp.ne.s32.totalorder %s307_s1, %s122_s18  ;;  %p126_p1 = scmp.lt.u32.totalorder %s122_s18, %s307_s1 }
   0x7   :  { %p128_p2 = pnand %p126_p1, %p123_p0 }
   0x9   :  { %131 = shalt.err (!%p128_p2)
}
   0xa   :  { %s132_s23 = scalar_lea.vmem %s29_s13, 256  ;;  %p137_p4 = scmp.lt.s32.totalorder %s29_s13, %s29_s13 }
   0xb   :  { %p133_p3 = scmp.ne.s32.totalorder %s29_s13, %s132_s23  ;;  %p138_p5 = scmp.lt.s32.totalorder %s132_s23, %s132_s23 }
   0xd   :  { %p139_p6 = por %p138_p5, %p137_p4 }
   0xf   :  { %p140_p7 = pnand %p139_p6, %p133_p3 }
  0x11   :  { %143 = shalt.err (!%p140_p7)
}
  0x12   :  { %s218_s24 = smov 128   ;;  %s219_s25 = smov 8  }
  0x13   :  { %34 = dma.hbm_to_vmem [thread:$0]  %s307_s1, 256, %s29_s13, [#allocation6], %s218_s24, %s218_s24, %s219_s25  }
  0x14   :  { %s144_s30 = scalar_lea.hbm %s306_s0, 256 }
  0x15   :  { %p145_p8 = scmp.ne.s32.totalorder %s306_s0, %s144_s30  ;;  %p148_p9 = scmp.lt.u32.totalorder %s144_s30, %s306_s0 }
  0x17   :  { %p150_p10 = pnand %p148_p9, %p145_p8 }
  0x19   :  { %153 = shalt.err (!%p150_p10)
}
  0x1a   :  { %s154_s8 = scalar_lea.vmem %s242_s15, 256  ;;  %p159_p12 = scmp.lt.s32.totalorder %s242_s15, %s242_s15 }
  0x1b   :  { %p155_p11 = scmp.ne.s32.totalorder %s242_s15, %s154_s8  ;;  %p160_p13 = scmp.lt.s32.totalorder %s154_s8, %s154_s8 }
  0x1d   :  { %p161_p0 = por %p160_p13, %p159_p12 }
  0x1f   :  { %p162_p1 = pnand %p161_p0, %p155_p11 }
  0x21   :  { %165 = shalt.err (!%p162_p1)
}
  0x22   :  { %22 = dma.hbm_to_vmem [thread:$0]  %s306_s0, 256, %s242_s15, [#allocation3], %s218_s24, %s218_s24, %s219_s25  }
  0x23   :  { %s220_s10 = smov [#allocation7]   ;;  %s166_s14 = scalar_lea.hbm %s308_s2, 256 }
  0x24   :  { %s40_s11 = sshll.u32 %s220_s10, 4  ;;  %p167_p2 = scmp.ne.s32.totalorder %s308_s2, %s166_s14  ;;  %s41_s11 = int_to_ptr.vmem [resolvable:$true] %s40_s11 }
  0x25   :  { %p170_p3 = scmp.lt.u32.totalorder %s166_s14, %s308_s2 }
  0x27   :  { %p172_p4 = pnand %p170_p3, %p167_p2 }
  0x29   :  { %175 = shalt.err (!%p172_p4)
}
  0x2a   :  { %s176_s20 = scalar_lea.vmem %s41_s11, 256  ;;  %p181_p6 = scmp.lt.s32.totalorder %s41_s11, %s41_s11 }
  0x2b   :  { %p177_p5 = scmp.ne.s32.totalorder %s41_s11, %s176_s20  ;;  %p182_p7 = scmp.lt.s32.totalorder %s176_s20, %s176_s20 }
  0x2d   :  { %p183_p8 = por %p182_p7, %p181_p6 }
  0x2f   :  { %p184_p9 = pnand %p183_p8, %p177_p5 }
  0x31   :  { %187 = shalt.err (!%p184_p9)
}
  0x32   :  { %46 = dma.hbm_to_vmem [thread:$0]  %s308_s2, 256, %s41_s11, [#allocation6], %s218_s24, %s218_s24, %s219_s25  }
  0x33   :  { %210 = dma.done.wait [#allocation3], 256  }
  0x34   :  { %211 = vsyncadd [#allocation3], 4294967040 }
  0x35   :  { %212 = dma.done.wait [#allocation6], 512  }
  0x36   :  { %213 = vsyncadd [#allocation6], 4294966784  ;;  %v56_v0 = vld [vmem:[#allocation2] sm:$0xff]  ;;  %v58_v1 = vld [vmem:[#allocation5] sm:$0xff]  ;;  %s221_s2 = smov [#allocation8]   ;;  %vm98_vm0 = vcmask 0  }
  0x37   :  { %v60_v2 = vld [vmem:[#allocation7] sm:$0xff]  ;;  %v62_v3 = vsub.f32 %v56_v0, %v58_v1  ;;  %v57_v5 = vld [vmem:[#allocation2 + $0x8] sm:$0xff]  ;;  %v59_v6 = vld [vmem:[#allocation5 + $0x8] sm:$0xff]  ;;  %s106_s21 = sshll.u32 %s221_s2, 4  ;;  %s107_s21 = int_to_ptr.vmem [resolvable:$true] %s106_s21 }
  0x38   :  { %v66_v4 = vsub.f32 %v56_v0, %v60_v2  ;;  %v61_v7 = vld [vmem:[#allocation7 + $0x8] sm:$0xff]  ;;  %v63_v8 = vsub.f32 %v57_v5, %v59_v6  ;;  %s188_s22 = scalar_lea.vmem %s107_s21, 16  ;;  %s192_s23 = scalar_lea.vmem %s107_s21, 32 }
  0x39   :  { %v67_v9 = vsub.f32 %v57_v5, %v61_v7  ;;  %v64_v10 = vmul.f32 %v62_v3, %v62_v3  ;;  %p189_p10 = scmp.ne.s32.totalorder %s107_s21, %s188_s22  ;;  %p193_p11 = scmp.lt.s32.totalorder %s107_s21, %s107_s21 }
  0x3a   :  { %v68_v11 = vmul.f32 %v66_v4, %v66_v4  ;;  %v65_v12 = vmul.f32 %v63_v8, %v63_v8  ;;  %p194_p12 = scmp.lt.s32.totalorder %s192_s23, %s188_s22 }
  0x3b   :  { %v69_v13 = vmul.f32 %v67_v9, %v67_v9 }
  0x3c   :  { %v70_v14 = vsub.f32 %v64_v10, %v68_v11  ;;  %p195_p13 = por %p194_p12, %p193_p11 }
  0x3d   :  { %v71_v15 = vsub.f32 %v65_v12, %v69_v13 }
  0x3e   :  { %72 = vadd.xlane.f32.xlu0 %v70_v14  ;;  %p196_p0 = pnand %p195_p13, %p189_p10 }
  0x42   :  { %74 = vadd.xlane.f32.xlu0 %v71_v15 }
  0xcb   :  { %v73_v16 = vpop.xlane.xlu0 %72 }
  0xcc   :  { %v76_v17 = vadd.f32 1.0, %v73_v16 }
  0xce   :  { %v78_v20 = vmax.f32 %v76_v17, 0.0 }
  0xcf   :  { %v75_v18 = vpop.xlane.xlu0 %74 }
  0xd0   :  { %v77_v19 = vadd.f32 1.0, %v75_v18 }
  0xd2   :  { %v79_v21 = vmax.f32 %v77_v19, 0.0 }
  0xd4   :  { %v91_v22 = vadd.f32 %v79_v21, %v78_v20 }
  0xd6   :  { %v92_v23 = vrot.slane %v91_v22, 4 }
  0xd8   :  { %v93_v24 = vadd.f32 %v92_v23, %v91_v22 }
  0xda   :  { %v94_v25 = vrot.slane %v93_v24, 2 }
  0xdc   :  { %v95_v26 = vadd.f32 %v94_v25, %v93_v24 }
  0xde   :  { %v96_v27 = vrot.slane %v95_v26, 1 }
  0xe0   :  { %v97_v28 = vadd.f32 %v96_v27, %v95_v26 }
  0xe2   :  { %99 = vst.msk [vmem:[#allocation8] sm:$0x1] %vm98_vm0, %v97_v28 }
  0xe3   :  { %199 = shalt.err (!%p196_p0)
}
  0xe4   :  { %s200_s26 = scalar_lea.hbm %s309_s3, 16 }
  0xe5   :  { %p201_p1 = scmp.ne.s32.totalorder %s309_s3, %s200_s26  ;;  %p204_p2 = scmp.lt.u32.totalorder %s200_s26, %s309_s3 }
  0xe7   :  { %p206_p3 = pnand %p204_p2, %p201_p1 }
  0xe9   :  { %209 = shalt.err (!%p206_p3)
}
  0xea   :  { %109 = dma.vmem_to_hbm [thread:$0]  %s107_s21, 16, %s309_s3, [#allocation4]  }
  0xeb   :  { %214 = dma.done.wait [#allocation4], 16  }
  0xec   :  { %215 = vsyncadd [#allocation4], 4294967280 }
  0xed   :  { %113 = vsyncpa [#allocation3], 1 }
  0xee   :  { %114 = vsyncpa [#allocation6], 1 }
  0xef   :  { %115 = vsyncpa [#allocation4], 1 }

</bundles_post_ra>
